<compile_context>
chip_gen: v7x
topology: tpu7x:2x2x1
jax: 0.10.0
libtpu: 0.0.40
codegen_flags: <defaults>
</compile_context>

<pallas_src>
import jax
import jax.numpy as jnp
from jax.experimental import pallas as pl
from jax.experimental.pallas import tpu as pltpu

HIDDEN = 8
LANE = 128


def mlp_kernel(x_ref, w1_ref, b1_ref, w2_ref, b2_ref, o_ref):
    # x_ref: (block_rows, LANE) f32 tile in VMEM; weights are SMEM scalars.
    x = x_ref[...]
    acc = jnp.full(x.shape, b2_ref[0], dtype=jnp.float32)
    for j in range(HIDDEN):                      # unrolled: pure VPU work
        h = jnp.maximum(x * w1_ref[j] + b1_ref[j], 0.0)
        acc = acc + h * w2_ref[j]
    o_ref[...] = acc.astype(o_ref.dtype)


def _round_up(a, m):
    return ((a + m - 1) // m) * m


def fit_model_forward(x, w1, b1, w2, b2, *, max_block_rows=8192):
    """x: (N, 1). w1: (1, 8), b1: (1, 8), w2: (8, 1), b2: (1, 1). Returns (N, 1)."""
    n = x.shape[0]

    # Flatten params to 1-D f32 for SMEM scalar reads.
    w1f = w1.reshape(-1).astype(jnp.float32)   # (8,)
    b1f = b1.reshape(-1).astype(jnp.float32)   # (8,)
    w2f = w2.reshape(-1).astype(jnp.float32)   # (8,)
    b2f = b2.reshape(-1).astype(jnp.float32)   # (1,)

    rows = pl.cdiv(n, LANE)
    tail = rows * LANE - n

    xf = x.astype(jnp.float32)
    if tail == 0:
        # Zero-copy: (N,1) -> (rows,128) is a free reshape.
        x2d = xf.reshape(rows, LANE)
    else:
        # Ragged tail: one small pad copy (only path that touches extra HBM).
        x2d = jnp.pad(xf.reshape(-1), (0, tail)).reshape(rows, LANE)

    # Block selection:
    #  * multiple of 8 sublanes (unless the whole array is smaller than 8 rows,
    #    in which case block == full array dims, which is always legal),
    #  * capped at max_block_rows (4 MiB / block) for VMEM headroom,
    #  * split so the grid has >= 2 steps when possible (v7x 2-TC sharding).
    if rows <= 8:
        block_rows = rows
    else:
        block_rows = min(max_block_rows, _round_up(pl.cdiv(rows, 2), 8))
    grid = (pl.cdiv(rows, block_rows),)

    smem_spec = pl.BlockSpec(memory_space=pltpu.MemorySpace.SMEM)

    y2d = pl.pallas_call(
        mlp_kernel,
        out_shape=jax.ShapeDtypeStruct((rows, LANE), jnp.float32),
        grid=grid,
        in_specs=[
            pl.BlockSpec((block_rows, LANE), lambda i: (i, 0)),  # x tile (VMEM)
            smem_spec, smem_spec, smem_spec, smem_spec,          # w1, b1, w2, b2
        ],
        out_specs=pl.BlockSpec((block_rows, LANE), lambda i: (i, 0)),
        compiler_params=pltpu.CompilerParams(
            dimension_semantics=("parallel",),
            vmem_limit_bytes=32 * 1024 * 1024,
        ),
    )(x2d, w1f, b1f, w2f, b2f)

    if tail == 0:
        return y2d.reshape(n, 1)                 # free reshape, no slice copy
    return y2d.reshape(-1)[:n].reshape(n, 1)


def init_params(key):
    # Deterministic init mirroring torch.nn.Linear's U(-1/sqrt(fan_in), +...).
    k1, k2, k3, k4 = jax.random.split(key, 4)
    bound1 = 1.0 / jnp.sqrt(1.0)   # linear1: fan_in = 1
    bound2 = 1.0 / jnp.sqrt(8.0)   # linear2: fan_in = 8
    w1 = jax.random.uniform(k1, (1, HIDDEN), jnp.float32, -bound1, bound1)  # [in, out]
    b1 = jax.random.uniform(k2, (1, HIDDEN), jnp.float32, -bound1, bound1)
    w2 = jax.random.uniform(k3, (HIDDEN, 1), jnp.float32, -bound2, bound2)  # [in, out]
    b2 = jax.random.uniform(k4, (1, 1), jnp.float32, -bound2, bound2)
    return w1, b1, w2, b2


def _reference(x, w1, b1, w2, b2):
    return jnp.maximum(x @ w1 + b1, 0.0) @ w2 + b2


if __name__ == "__main__":
    key = jax.random.PRNGKey(0)
    pkey, xkey, xkey2 = jax.random.split(key, 3)
    w1, b1, w2, b2 = init_params(pkey)

    # Primary run: N divisible by 128 -> zero-copy reshape path.
    n = 384
    x = jax.random.normal(xkey, (n, 1), jnp.float32)
    y = fit_model_forward(x, w1, b1, w2, b2)
    jax.block_until_ready(y)
    assert y.shape == (n, 1)
    assert jnp.allclose(y, _reference(x, w1, b1, w2, b2), atol=1e-5), \
        "mismatch vs reference (aligned path)"

    # Ragged-tail run: N not a multiple of 128 (exercises the pad/partial path).
    n2 = 300
    x2 = jax.random.normal(xkey2, (n2, 1), jnp.float32)
    y2 = fit_model_forward(x2, w1, b1, w2, b2)
    jax.block_until_ready(y2)
    assert y2.shape == (n2, 1)
    assert jnp.allclose(y2, _reference(x2, w1, b1, w2, b2), atol=1e-5), \
        "mismatch vs reference (tail path)"

    print("KERNEL_OK")
</pallas_src>

<mosaic_0001>
module attributes {stable_mosaic.version = 11 : i64} {
  func.func @mlp_kernel(%arg0: i32, %arg1: memref<3x128xf32, #tpu.memory_space<vmem>>, %arg2: memref<8xf32, #tpu.memory_space<smem>>, %arg3: memref<8xf32, #tpu.memory_space<smem>>, %arg4: memref<8xf32, #tpu.memory_space<smem>>, %arg5: memref<1xf32, #tpu.memory_space<smem>>, %arg6: memref<3x128xf32, #tpu.memory_space<vmem>>) attributes {dimension_semantics = [#tpu.dimension_semantics<parallel>], iteration_bounds = array<i64: 1>, scalar_prefetch = 0 : i64, scratch_operands = 0 : i64, tpu.core_type = #tpu.core_type<tc>, window_params = [{transform_indices = @transform_0, window_bounds = array<i64: 3, 128>}, {transform_indices = @transform_1, window_bounds = array<i64: 8>}, {transform_indices = @transform_2, window_bounds = array<i64: 8>}, {transform_indices = @transform_3, window_bounds = array<i64: 8>}, {transform_indices = @transform_4, window_bounds = array<i64: 1>}, {transform_indices = @transform_5, window_bounds = array<i64: 3, 128>}]} {
    %c0 = arith.constant 0 : index
    %c0_0 = arith.constant 0 : index
    %0 = vector.load %arg1[%c0, %c0_0] : memref<3x128xf32, #tpu.memory_space<vmem>>, vector<3x128xf32>
    %c0_1 = arith.constant 0 : index
    %1 = memref.load %arg5[%c0_1] : memref<1xf32, #tpu.memory_space<smem>>
    %2 = vector.broadcast %1 : f32 to vector<3x128xf32>
    %c0_2 = arith.constant 0 : index
    %3 = memref.load %arg2[%c0_2] : memref<8xf32, #tpu.memory_space<smem>>
    %4 = vector.broadcast %3 : f32 to vector<3x128xf32>
    %5 = arith.mulf %0, %4 : vector<3x128xf32>
    %c0_3 = arith.constant 0 : index
    %6 = memref.load %arg3[%c0_3] : memref<8xf32, #tpu.memory_space<smem>>
    %7 = vector.broadcast %6 : f32 to vector<3x128xf32>
    %8 = arith.addf %5, %7 : vector<3x128xf32>
    %cst = arith.constant 0.000000e+00 : f32
    %9 = vector.broadcast %cst : f32 to vector<3x128xf32>
    %10 = arith.maximumf %8, %9 : vector<3x128xf32>
    %c0_4 = arith.constant 0 : index
    %11 = memref.load %arg4[%c0_4] : memref<8xf32, #tpu.memory_space<smem>>
    %12 = vector.broadcast %11 : f32 to vector<3x128xf32>
    %13 = arith.mulf %10, %12 : vector<3x128xf32>
    %14 = arith.addf %2, %13 : vector<3x128xf32>
    %c1 = arith.constant 1 : index
    %15 = memref.load %arg2[%c1] : memref<8xf32, #tpu.memory_space<smem>>
    %16 = vector.broadcast %15 : f32 to vector<3x128xf32>
    %17 = arith.mulf %0, %16 : vector<3x128xf32>
    %c1_5 = arith.constant 1 : index
    %18 = memref.load %arg3[%c1_5] : memref<8xf32, #tpu.memory_space<smem>>
    %19 = vector.broadcast %18 : f32 to vector<3x128xf32>
    %20 = arith.addf %17, %19 : vector<3x128xf32>
    %cst_6 = arith.constant 0.000000e+00 : f32
    %21 = vector.broadcast %cst_6 : f32 to vector<3x128xf32>
    %22 = arith.maximumf %20, %21 : vector<3x128xf32>
    %c1_7 = arith.constant 1 : index
    %23 = memref.load %arg4[%c1_7] : memref<8xf32, #tpu.memory_space<smem>>
    %24 = vector.broadcast %23 : f32 to vector<3x128xf32>
    %25 = arith.mulf %22, %24 : vector<3x128xf32>
    %26 = arith.addf %14, %25 : vector<3x128xf32>
    %c2 = arith.constant 2 : index
    %27 = memref.load %arg2[%c2] : memref<8xf32, #tpu.memory_space<smem>>
    %28 = vector.broadcast %27 : f32 to vector<3x128xf32>
    %29 = arith.mulf %0, %28 : vector<3x128xf32>
    %c2_8 = arith.constant 2 : index
    %30 = memref.load %arg3[%c2_8] : memref<8xf32, #tpu.memory_space<smem>>
    %31 = vector.broadcast %30 : f32 to vector<3x128xf32>
    %32 = arith.addf %29, %31 : vector<3x128xf32>
    %cst_9 = arith.constant 0.000000e+00 : f32
    %33 = vector.broadcast %cst_9 : f32 to vector<3x128xf32>
    %34 = arith.maximumf %32, %33 : vector<3x128xf32>
    %c2_10 = arith.constant 2 : index
    %35 = memref.load %arg4[%c2_10] : memref<8xf32, #tpu.memory_space<smem>>
    %36 = vector.broadcast %35 : f32 to vector<3x128xf32>
    %37 = arith.mulf %34, %36 : vector<3x128xf32>
    %38 = arith.addf %26, %37 : vector<3x128xf32>
    %c3 = arith.constant 3 : index
    %39 = memref.load %arg2[%c3] : memref<8xf32, #tpu.memory_space<smem>>
    %40 = vector.broadcast %39 : f32 to vector<3x128xf32>
    %41 = arith.mulf %0, %40 : vector<3x128xf32>
    %c3_11 = arith.constant 3 : index
    %42 = memref.load %arg3[%c3_11] : memref<8xf32, #tpu.memory_space<smem>>
    %43 = vector.broadcast %42 : f32 to vector<3x128xf32>
    %44 = arith.addf %41, %43 : vector<3x128xf32>
    %cst_12 = arith.constant 0.000000e+00 : f32
    %45 = vector.broadcast %cst_12 : f32 to vector<3x128xf32>
    %46 = arith.maximumf %44, %45 : vector<3x128xf32>
    %c3_13 = arith.constant 3 : index
    %47 = memref.load %arg4[%c3_13] : memref<8xf32, #tpu.memory_space<smem>>
    %48 = vector.broadcast %47 : f32 to vector<3x128xf32>
    %49 = arith.mulf %46, %48 : vector<3x128xf32>
    %50 = arith.addf %38, %49 : vector<3x128xf32>
    %c4 = arith.constant 4 : index
    %51 = memref.load %arg2[%c4] : memref<8xf32, #tpu.memory_space<smem>>
    %52 = vector.broadcast %51 : f32 to vector<3x128xf32>
    %53 = arith.mulf %0, %52 : vector<3x128xf32>
    %c4_14 = arith.constant 4 : index
    %54 = memref.load %arg3[%c4_14] : memref<8xf32, #tpu.memory_space<smem>>
    %55 = vector.broadcast %54 : f32 to vector<3x128xf32>
    %56 = arith.addf %53, %55 : vector<3x128xf32>
    %cst_15 = arith.constant 0.000000e+00 : f32
    %57 = vector.broadcast %cst_15 : f32 to vector<3x128xf32>
    %58 = arith.maximumf %56, %57 : vector<3x128xf32>
    %c4_16 = arith.constant 4 : index
    %59 = memref.load %arg4[%c4_16] : memref<8xf32, #tpu.memory_space<smem>>
    %60 = vector.broadcast %59 : f32 to vector<3x128xf32>
    %61 = arith.mulf %58, %60 : vector<3x128xf32>
    %62 = arith.addf %50, %61 : vector<3x128xf32>
    %c5 = arith.constant 5 : index
    %63 = memref.load %arg2[%c5] : memref<8xf32, #tpu.memory_space<smem>>
    %64 = vector.broadcast %63 : f32 to vector<3x128xf32>
    %65 = arith.mulf %0, %64 : vector<3x128xf32>
    %c5_17 = arith.constant 5 : index
    %66 = memref.load %arg3[%c5_17] : memref<8xf32, #tpu.memory_space<smem>>
    %67 = vector.broadcast %66 : f32 to vector<3x128xf32>
    %68 = arith.addf %65, %67 : vector<3x128xf32>
    %cst_18 = arith.constant 0.000000e+00 : f32
    %69 = vector.broadcast %cst_18 : f32 to vector<3x128xf32>
    %70 = arith.maximumf %68, %69 : vector<3x128xf32>
    %c5_19 = arith.constant 5 : index
    %71 = memref.load %arg4[%c5_19] : memref<8xf32, #tpu.memory_space<smem>>
    %72 = vector.broadcast %71 : f32 to vector<3x128xf32>
    %73 = arith.mulf %70, %72 : vector<3x128xf32>
    %74 = arith.addf %62, %73 : vector<3x128xf32>
    %c6 = arith.constant 6 : index
    %75 = memref.load %arg2[%c6] : memref<8xf32, #tpu.memory_space<smem>>
    %76 = vector.broadcast %75 : f32 to vector<3x128xf32>
    %77 = arith.mulf %0, %76 : vector<3x128xf32>
    %c6_20 = arith.constant 6 : index
    %78 = memref.load %arg3[%c6_20] : memref<8xf32, #tpu.memory_space<smem>>
    %79 = vector.broadcast %78 : f32 to vector<3x128xf32>
    %80 = arith.addf %77, %79 : vector<3x128xf32>
    %cst_21 = arith.constant 0.000000e+00 : f32
    %81 = vector.broadcast %cst_21 : f32 to vector<3x128xf32>
    %82 = arith.maximumf %80, %81 : vector<3x128xf32>
    %c6_22 = arith.constant 6 : index
    %83 = memref.load %arg4[%c6_22] : memref<8xf32, #tpu.memory_space<smem>>
    %84 = vector.broadcast %83 : f32 to vector<3x128xf32>
    %85 = arith.mulf %82, %84 : vector<3x128xf32>
    %86 = arith.addf %74, %85 : vector<3x128xf32>
    %c7 = arith.constant 7 : index
    %87 = memref.load %arg2[%c7] : memref<8xf32, #tpu.memory_space<smem>>
    %88 = vector.broadcast %87 : f32 to vector<3x128xf32>
    %89 = arith.mulf %0, %88 : vector<3x128xf32>
    %c7_23 = arith.constant 7 : index
    %90 = memref.load %arg3[%c7_23] : memref<8xf32, #tpu.memory_space<smem>>
    %91 = vector.broadcast %90 : f32 to vector<3x128xf32>
    %92 = arith.addf %89, %91 : vector<3x128xf32>
    %cst_24 = arith.constant 0.000000e+00 : f32
    %93 = vector.broadcast %cst_24 : f32 to vector<3x128xf32>
    %94 = arith.maximumf %92, %93 : vector<3x128xf32>
    %c7_25 = arith.constant 7 : index
    %95 = memref.load %arg4[%c7_25] : memref<8xf32, #tpu.memory_space<smem>>
    %96 = vector.broadcast %95 : f32 to vector<3x128xf32>
    %97 = arith.mulf %94, %96 : vector<3x128xf32>
    %98 = arith.addf %86, %97 : vector<3x128xf32>
    %c0_26 = arith.constant 0 : index
    %c0_27 = arith.constant 0 : index
    %99 = vector.load %arg6[%c0_26, %c0_27] : memref<3x128xf32, #tpu.memory_space<vmem>>, vector<3x128xf32>
    tpu.vector_store %arg6[%c0_26, %c0_27], %98 {strides = array<i32>} : memref<3x128xf32, #tpu.memory_space<vmem>>, vector<3x128xf32>,
    return
  }
  func.func @transform_0(%arg0: i32) -> (i32, i32) {
    %c0_i32 = arith.constant 0 : i32
    %c0_i32_0 = arith.constant 0 : i32
    return %arg0, %c0_i32 : i32, i32
  }
  func.func @transform_1(%arg0: i32) -> i32 {
    %c0_i32 = arith.constant 0 : i32
    %c0_i32_0 = arith.constant 0 : i32
    return %c0_i32 : i32
  }
  func.func @transform_2(%arg0: i32) -> i32 {
    %c0_i32 = arith.constant 0 : i32
    %c0_i32_0 = arith.constant 0 : i32
    return %c0_i32 : i32
  }
  func.func @transform_3(%arg0: i32) -> i32 {
    %c0_i32 = arith.constant 0 : i32
    %c0_i32_0 = arith.constant 0 : i32
    return %c0_i32 : i32
  }
  func.func @transform_4(%arg0: i32) -> i32 {
    %c0_i32 = arith.constant 0 : i32
    %c0_i32_0 = arith.constant 0 : i32
    return %c0_i32 : i32
  }
  func.func @transform_5(%arg0: i32) -> (i32, i32) {
    %c0_i32 = arith.constant 0 : i32
    %c0_i32_0 = arith.constant 0 : i32
    return %arg0, %c0_i32 : i32, i32
  }
}

</mosaic_0001>

<bundles_post_ra>
// kernel: tpu_custom_call.1
= control target key start
LH: loop header
LB: loop body
LE: loop exit
PB: predicated region body
PF: predicated region fallthrough
CT: control target
= control target key end

     0   :  { %11 = vsyncpa [#allocation4], 0  ;;  %s428_s0 = inlined_call_operand.hbm [shape: f32[3,128], index: 0, kind: input, shape index: {}]   ;;  %s429_s1 = inlined_call_operand.vmem [shape: f32[8], index: 1, kind: input, shape index: {}]   ;;  %s430_s2 = inlined_call_operand.vmem [shape: f32[8], index: 2, kind: input, shape index: {}]   ;;  %s431_s3 = inlined_call_operand.vmem [shape: f32[8], index: 3, kind: input, shape index: {}]   ;;  %s432_s4 = inlined_call_operand.<no memory space> [shape: f32[1], index: 4, kind: input, shape index: {}]   ;;  %s433_s5 = inlined_call_operand.hbm [shape: f32[3,128], index: 5, kind: output, shape index: {}]  }
   0x1   :  { %12 = vsyncpa [#allocation6], 0 }
   0x2   :  { %13 = vsyncpa [#allocation9], 0  ;;  %s41_s20 = sshll.u32 %s430_s2, 4  ;;  %s42_s20 = int_to_ptr.vmem [resolvable:$true] %s41_s20 }
   0x3   :  { %14 = vsyncpa [#allocation5], 0  ;;  %s205_s21 = scalar_lea.vmem %s42_s20, 16  ;;  %p210_p1 = scmp.lt.s32.totalorder %s42_s20, %s42_s20 }
   0x4   :  { %p206_p0 = scmp.ne.s32.totalorder %s42_s20, %s205_s21  ;;  %p211_p2 = scmp.lt.s32.totalorder %s205_s21, %s205_s21 }
   0x6   :  { %p212_p3 = por %p211_p2, %p210_p1 }
   0x8   :  { %p213_p4 = pnand %p212_p3, %p206_p0 }
   0xa   :  { %216 = shalt.err (!%p213_p4)
}
   0xb   :  { %s293_s22 = smov [#allocation8]   ;;  %s294_s23 = smov [#allocation3]  }
   0xc   :  { %44 = dma.vmem_to_smem %s42_s20, 16, %s293_s22, [#allocation9]  }
   0xd   :  { %s21_s24 = sshll.u32 %s294_s23, 4  ;;  %s31_s27 = sshll.u32 %s429_s1, 4  ;;  %s22_s24 = int_to_ptr.vmem [resolvable:$true] %s21_s24  ;;  %s32_s27 = int_to_ptr.vmem [resolvable:$true] %s31_s27 }
   0xe   :  { %s217_s29 = scalar_lea.hbm %s428_s0, 64 }
   0xf   :  { %p218_p5 = scmp.ne.s32.totalorder %s428_s0, %s217_s29  ;;  %p221_p6 = scmp.lt.u32.totalorder %s217_s29, %s428_s0 }
  0x11   :  { %p223_p7 = pnand %p221_p6, %p218_p5 }
  0x13   :  { %226 = shalt.err (!%p223_p7)
}
  0x14   :  { %s227_s9 = scalar_lea.vmem %s22_s24, 64  ;;  %p232_p9 = scmp.lt.s32.totalorder %s22_s24, %s22_s24 }
  0x15   :  { %p228_p8 = scmp.ne.s32.totalorder %s22_s24, %s227_s9  ;;  %p233_p10 = scmp.lt.s32.totalorder %s227_s9, %s227_s9 }
  0x17   :  { %p234_p11 = por %p233_p10, %p232_p9 }
  0x19   :  { %p235_p12 = pnand %p234_p11, %p228_p8 }
  0x1b   :  { %238 = shalt.err (!%p235_p12)
}
  0x1c   :  { %24 = dma.hbm_to_vmem [thread:$0]  %s428_s0, 64, %s22_s24, [#allocation4]  }
  0x1d   :  { %s51_s13 = sshll.u32 %s431_s3, 4  ;;  %s239_s14 = scalar_lea.vmem %s32_s27, 16  ;;  %s52_s13 = int_to_ptr.vmem [resolvable:$true] %s51_s13 }
  0x1e   :  { %p240_p13 = scmp.ne.s32.totalorder %s32_s27, %s239_s14  ;;  %p244_p0 = scmp.lt.s32.totalorder %s32_s27, %s32_s27 }
  0x1f   :  { %p245_p1 = scmp.lt.s32.totalorder %s239_s14, %s239_s14 }
  0x21   :  { %p246_p2 = por %p245_p1, %p244_p0 }
  0x23   :  { %p247_p3 = pnand %p246_p2, %p240_p13 }
  0x25   :  { %250 = shalt.err (!%p247_p3)
}
  0x26   :  { %s295_s15 = smov [#allocation7]   ;;  %s251_s16 = scalar_lea.vmem %s52_s13, 16 }
  0x27   :  { %34 = dma.vmem_to_smem %s32_s27, 16, %s295_s15, [#allocation6]  }
  0x28   :  { %p252_p4 = scmp.ne.s32.totalorder %s52_s13, %s251_s16  ;;  %p256_p5 = scmp.lt.s32.totalorder %s52_s13, %s52_s13 }
  0x29   :  { %p257_p6 = scmp.lt.s32.totalorder %s251_s16, %s251_s16 }
  0x2b   :  { %p258_p7 = por %p257_p6, %p256_p5 }
  0x2d   :  { %p259_p8 = pnand %p258_p7, %p252_p4 }
  0x2f   :  { %262 = shalt.err (!%p259_p8)
}
  0x30   :  { %s296_s0 = smov [#allocation10]  }
  0x31   :  { %54 = dma.vmem_to_smem %s52_s13, 16, %s296_s0, [#allocation9]  }
  0x32   :  { %285 = dma.done.wait [#allocation4], 64  }
  0x33   :  { %286 = vsyncadd [#allocation4], 4294967232 }
  0x34   :  { %287 = dma.done.wait [#allocation6], 16  }
  0x35   :  { %288 = vsyncadd [#allocation6], 4294967280 }
  0x36   :  { %289 = dma.done.wait [#allocation9], 32  }
  0x37   :  { %290 = vsyncadd [#allocation9], 4294967264 }
  0x38   :  { %69 = sfence }
  0x39   :  { %s73_s3 = sld [smem:[#allocation7]]  ;;  %s179_s19 = sld [smem:[#allocation7 + $0x1]]  ;;  %v355_v0 = vld [vmem:[#allocation3] sm:$0x7]  ;;  %v72_v5 = vstv %s432_s4 }
  0x3a   :  { %s76_s17 = sld [smem:[#allocation8]]  ;;  %s180_s20 = sld [smem:[#allocation8 + $0x1]] }
  0x3b   :  { %s349_s18 = sld [smem:[#allocation10]]  ;;  %s351_s21 = sld [smem:[#allocation10 + $0x1]] }
  0x3c   :  { %s182_s22 = sld [smem:[#allocation7 + $0x2]]  ;;  %s185_s25 = sld [smem:[#allocation7 + $0x3]] }
  0x3d   :  { %s353_s23 = sld [smem:[#allocation8 + $0x2]]  ;;  %s359_s26 = sld [smem:[#allocation8 + $0x3]] }
  0x3e   :  { %s357_s24 = sld [smem:[#allocation10 + $0x2]]  ;;  %s361_s27 = sld [smem:[#allocation10 + $0x3]] }
  0x3f   :  { %v74_v1 = vstv %s73_s3  ;;  %s363_s2 = sld [smem:[#allocation7 + $0x4]]  ;;  %v85_v4 = vstv %s179_s19  ;;  %s368_s29 = sld [smem:[#allocation7 + $0x5]] }
  0x40   :  { %v77_v2 = vstv %s76_s17  ;;  %s365_s28 = sld [smem:[#allocation8 + $0x4]]  ;;  %v75_v3 = vmul.f32 %v74_v1, %v355_v0  ;;  %v86_v6 = vmul.f32 %v85_v4, %v355_v0  ;;  %v88_v7 = vstv %s180_s20  ;;  %s376_s8 = sld [smem:[#allocation8 + $0x5]] }
  0x41   :  { %s374_s7 = sld [smem:[#allocation10 + $0x4]]  ;;  %v81_v9 = vstv %s349_s18  ;;  %s380_s9 = sld [smem:[#allocation7 + $0x6]]  ;;  %v92_v13 = vstv %s351_s21 }
  0x42   :  { %v78_v8 = vadd.f32 %v77_v2, %v75_v3  ;;  %v96_v10 = vstv %s182_s22  ;;  %s382_s1 = sld [smem:[#allocation8 + $0x6]]  ;;  %v89_v12 = vadd.f32 %v88_v7, %v86_v6  ;;  %v107_v15 = vstv %s185_s25  ;;  %s386_s4 = sld [smem:[#allocation10 + $0x5]] }
  0x43   :  { %v99_v11 = vstv %s353_s23  ;;  %v97_v14 = vmul.f32 %v96_v10, %v355_v0  ;;  %s388_s10 = sld [smem:[#allocation7 + $0x7]]  ;;  %v108_v18 = vmul.f32 %v107_v15, %v355_v0  ;;  %v110_v19 = vstv %s359_s26  ;;  %s399_s12 = sld [smem:[#allocation10 + $0x6]] }
  0x44   :  { %v79_v16 = vmax.f32 %v78_v8, 0.0  ;;  %v103_v17 = vstv %s357_s24  ;;  %s393_s11 = sld [smem:[#allocation8 + $0x7]]  ;;  %v90_v20 = vmax.f32 %v89_v12, 0.0  ;;  %v114_v26 = vstv %s361_s27  ;;  %s297_s14 = smov [#allocation11]  }
  0x45   :  { %v100_v21 = vadd.f32 %v99_v11, %v97_v14  ;;  %v118_v22 = vstv %s363_s2  ;;  %v111_v25 = vadd.f32 %v110_v19, %v108_v18  ;;  %v129_v30 = vstv %s368_s29  ;;  %s403_s13 = sld [smem:[#allocation10 + $0x7]]  ;;  %s168_s15 = sshll.u32 %s297_s14, 4  ;;  %s169_s15 = int_to_ptr.vmem [resolvable:$true] %s168_s15 }
  0x46   :  { %v121_v23 = vstv %s365_s28  ;;  %v82_v24 = vmul.f32 %v81_v9, %v79_v16  ;;  %v119_v27 = vmul.f32 %v118_v22, %v355_v0  ;;  %v93_v28 = vmul.f32 %v92_v13, %v90_v20  ;;  %s263_s16 = scalar_lea.vmem %s169_s15, 64  ;;  %p268_p10 = scmp.lt.s32.totalorder %s169_s15, %s169_s15 }
  0x47   :  { %v101_v29 = vmax.f32 %v100_v21, 0.0  ;;  %v132_v31 = vstv %s376_s8  ;;  %v112_v33 = vmax.f32 %v111_v25, 0.0  ;;  %v130_v35 = vmul.f32 %v129_v30, %v355_v0  ;;  %p264_p9 = scmp.ne.s32.totalorder %s169_s15, %s263_s16  ;;  %p269_p11 = scmp.lt.s32.totalorder %s263_s16, %s263_s16 }
  0x48   :  { %v83_v32 = vadd.f32 %v82_v24, %v72_v5  ;;  %v122_v34 = vadd.f32 %v121_v23, %v119_v27  ;;  %v125_v37 = vstv %s374_s7  ;;  %v140_v38 = vstv %s380_s9 }
  0x49   :  { %v104_v36 = vmul.f32 %v103_v17, %v101_v29  ;;  %v143_v39 = vstv %s382_s1  ;;  %v115_v41 = vmul.f32 %v114_v26, %v112_v33  ;;  %v133_v43 = vadd.f32 %v132_v31, %v130_v35  ;;  %p270_p12 = por %p269_p11, %p268_p10 }
  0x4a   :  { %v94_v40 = vadd.f32 %v93_v28, %v83_v32  ;;  %v123_v42 = vmax.f32 %v122_v34, 0.0  ;;  %v136_v44 = vstv %s386_s4  ;;  %v141_v45 = vmul.f32 %v140_v38, %v355_v0 }
  0x4b   :  { %v151_v46 = vstv %s388_s10  ;;  %v154_v47 = vstv %s393_s11  ;;  %v134_v50 = vmax.f32 %v133_v43, 0.0  ;;  %v147_v55 = vstv %s399_s12  ;;  %p271_p13 = pnand %p270_p12, %p264_p9 }
  0x4c   :  { %v105_v48 = vadd.f32 %v104_v36, %v94_v40  ;;  %v126_v49 = vmul.f32 %v125_v37, %v123_v42  ;;  %v152_v51 = vmul.f32 %v151_v46, %v355_v0  ;;  %v144_v52 = vadd.f32 %v143_v39, %v141_v45 }
  0x4d   :  { %v137_v54 = vmul.f32 %v136_v44, %v134_v50  ;;  %v158_v58 = vstv %s403_s13 }
  0x4e   :  { %v116_v53 = vadd.f32 %v115_v41, %v105_v48  ;;  %v155_v56 = vadd.f32 %v154_v47, %v152_v51  ;;  %v145_v57 = vmax.f32 %v144_v52, 0.0 }
  0x50   :  { %v127_v59 = vadd.f32 %v126_v49, %v116_v53  ;;  %v156_v60 = vmax.f32 %v155_v56, 0.0  ;;  %v148_v61 = vmul.f32 %v147_v55, %v145_v57 }
  0x52   :  { %v138_v62 = vadd.f32 %v137_v54, %v127_v59  ;;  %v159_v63 = vmul.f32 %v158_v58, %v156_v60 }
  0x54   :  { %v149_v1 = vadd.f32 %v148_v61, %v138_v62 }
  0x56   :  { %v160_v2 = vadd.f32 %v159_v63, %v149_v1 }
  0x58   :  { %161 = vst [vmem:[#allocation11] sm:$0x7] %v160_v2 }
  0x59   :  { %274 = shalt.err (!%p271_p13)
}
  0x5a   :  { %s275_s17 = scalar_lea.hbm %s433_s5, 64 }
  0x5b   :  { %p276_p0 = scmp.ne.s32.totalorder %s433_s5, %s275_s17  ;;  %p279_p1 = scmp.lt.u32.totalorder %s275_s17, %s433_s5 }
  0x5d   :  { %p281_p2 = pnand %p279_p1, %p276_p0 }
  0x5f   :  { %284 = shalt.err (!%p281_p2)
}
  0x60   :  { %171 = dma.vmem_to_hbm [thread:$0]  %s169_s15, 64, %s433_s5, [#allocation5]  }
  0x61   :  { %291 = dma.done.wait [#allocation5], 64  }
  0x62   :  { %292 = vsyncadd [#allocation5], 4294967232 }
  0x63   :  { %175 = vsyncpa [#allocation4], 1 }
  0x64   :  { %176 = vsyncpa [#allocation5], 1 }
  0x65   :  { %177 = vsyncpa [#allocation6], 1 }
  0x66   :  { %178 = vsyncpa [#allocation9], 1 }

</bundles_post_ra>
